<compile_context>
chip_gen: v7x
topology: tpu7x:2x2x1
jax: 0.10.0
libtpu: 0.0.40
codegen_flags: <defaults>
</compile_context>

<pallas_src>
import functools

import jax
import jax.numpy as jnp
from jax import lax
from jax.experimental import pallas as pl
from jax.experimental.pallas import tpu as pltpu

_DIMS = (40, 256, 128, 64, 32, 1)


def _round_up(n, m):
    return (n + m - 1) // m * m


def _pick_tile(batch, block_b):
    """Batch tile: multiple of 128, >=2 tiles when there is enough work (v7x)."""
    b128 = _round_up(batch, 128)
    if b128 <= 128:
        return 128
    half = _round_up((b128 + 1) // 2, 128)   # at least two tiles of work
    return max(128, min(block_b, half))


def _mlp_kernel(x_ref,
                w1_ref, b1_ref,
                w2_ref, b2_ref,
                w3_ref, b3_ref,
                w4_ref, b4_ref,
                w5_ref, b5_ref,
                o_ref):
    cdt = w1_ref.dtype              # compute dtype (bf16)
    x = x_ref[...]                  # [TB, 40] bf16, batch-major tile

    # Layer 1: contract the feature axis of both operands -> feature-major
    # activations [256, TB] (w1 @ x.T); Mosaic handles the transposed RHS.
    h = lax.dot_general(w1_ref[...], x, (((1,), (1,)), ((), ())),
                        preferred_element_type=jnp.float32)
    h = jnp.maximum(h + b1_ref[...], 0.0).astype(cdt)          # [256, TB]

    h = jnp.dot(w2_ref[...], h, preferred_element_type=jnp.float32)
    h = jnp.maximum(h + b2_ref[...], 0.0).astype(cdt)          # [128, TB]

    h = jnp.dot(w3_ref[...], h, preferred_element_type=jnp.float32)
    h = jnp.maximum(h + b3_ref[...], 0.0).astype(cdt)          # [64, TB]

    h = jnp.dot(w4_ref[...], h, preferred_element_type=jnp.float32)
    h = jnp.maximum(h + b4_ref[...], 0.0).astype(cdt)          # [32, TB]

    # Final layer (out_dim = 1): VPU multiply + sublane reduce instead of an
    # M=1 MXU matmul.  f32 products of bf16 inputs, f32 accumulation.
    w5 = w5_ref[...].astype(jnp.float32)                        # [32, 1]
    y = jnp.sum(w5 * h.astype(jnp.float32), axis=0, keepdims=True) + b5_ref[...]
    o_ref[...] = y.astype(o_ref.dtype)                          # [1, TB] lane-dense


@functools.partial(jax.jit, static_argnames=("block_b", "compute_dtype"))
def prediction_model2_forward(x, params, *, block_b=2048, compute_dtype=jnp.bfloat16):
    """x: [B, 40] float32.  params: list of (W[out, in], b[out]) in PyTorch layout."""
    B, F = x.shape
    assert F == _DIMS[0], F

    tb = _pick_tile(B, block_b)
    b_pad = _round_up(B, tb)
    n_tiles = b_pad // tb

    # Single fused pad + bf16 convert; x stays batch-major (no HBM transpose).
    x_p = jnp.pad(x, ((0, b_pad - B), (0, 0))).astype(compute_dtype)  # [B_pad, 40]

    flat_args = [x_p]
    in_specs = [pl.BlockSpec((tb, F), lambda i: (i, 0))]

    # Layers 1-4: W [out, in] bf16, bias [out, 1] f32 (added after f32 accum).
    for (w, b) in params[:-1]:
        wk = w.astype(compute_dtype)
        bk = b.reshape(-1, 1).astype(jnp.float32)
        flat_args += [wk, bk]
        in_specs += [pl.BlockSpec(wk.shape, lambda i: (0, 0)),   # VMEM-resident
                     pl.BlockSpec(bk.shape, lambda i: (0, 0))]

    # Final layer: W5 stored as a [32, 1] column, bias as [1, 1].
    w5, b5 = params[-1]
    w5c = w5.reshape(-1, 1).astype(compute_dtype)                # [32, 1]
    b5c = b5.reshape(1, 1).astype(jnp.float32)                   # [1, 1]
    flat_args += [w5c, b5c]
    in_specs += [pl.BlockSpec(w5c.shape, lambda i: (0, 0)),
                 pl.BlockSpec(b5c.shape, lambda i: (0, 0))]

    flops = 2 * b_pad * sum(_DIMS[i] * _DIMS[i + 1] for i in range(len(_DIMS) - 1))
    bytes_accessed = int(
        x_p.size * x_p.dtype.itemsize
        + sum(a.size * a.dtype.itemsize for a in flat_args[1:])
        + b_pad * 4)

    out = pl.pallas_call(
        _mlp_kernel,
        out_shape=jax.ShapeDtypeStruct((1, b_pad), jnp.float32),
        grid=(n_tiles,),
        in_specs=in_specs,
        out_specs=pl.BlockSpec((1, tb), lambda i: (0, i)),
        compiler_params=pltpu.CompilerParams(
            dimension_semantics=("parallel",),     # v7x: batch tiles split over 2 TCs
            vmem_limit_bytes=32 << 20),            # safe on v5e/v6e (128 MiB) and v7x (64 MiB)
        cost_estimate=pl.CostEstimate(
            flops=flops, transcendentals=0, bytes_accessed=bytes_accessed),
    )(*flat_args)

    return out[0, :B].reshape(B, 1)


def init_params(key):
    """PyTorch nn.Linear-style init; weights stored [out, in], biases [out]."""
    params = []
    for i in range(len(_DIMS) - 1):
        fan_in, fan_out = _DIMS[i], _DIMS[i + 1]
        key, kw, kb = jax.random.split(key, 3)
        bound = 1.0 / jnp.sqrt(fan_in)
        w = jax.random.uniform(kw, (fan_out, fan_in), jnp.float32, -bound, bound)
        b = jax.random.uniform(kb, (fan_out,), jnp.float32, -bound, bound)
        params.append((w, b))
    return params


def reference_forward_f32(x, params):
    h = x
    for i, (w, b) in enumerate(params):
        h = h @ w.T + b
        if i < len(params) - 1:
            h = jnp.maximum(h, 0.0)
    return h


def reference_forward_bf16(x, params):
    """Same bf16-operand / f32-accumulation rounding as the kernel."""
    h = x.astype(jnp.bfloat16)
    for i, (w, b) in enumerate(params):
        h = jnp.dot(h, w.T.astype(jnp.bfloat16),
                    preferred_element_type=jnp.float32) + b
        if i < len(params) - 1:
            h = jnp.maximum(h, 0.0).astype(jnp.bfloat16)
    return h


if __name__ == "__main__":
    key = jax.random.PRNGKey(0)
    key, kx = jax.random.split(key)

    B = 8
    x = jax.random.normal(kx, (B, 40), jnp.float32)
    params = init_params(key)

    out = prediction_model2_forward(x, params)
    out = jax.block_until_ready(out)
    assert out.shape == (B, 1), out.shape

    ref16 = reference_forward_bf16(x, params)
    ref32 = reference_forward_f32(x, params)
    err16 = jnp.max(jnp.abs(out - ref16))
    err32 = jnp.max(jnp.abs(out - ref32))
    assert jnp.allclose(out, ref16, atol=2e-3, rtol=2e-3), f"bf16-ref max err {err16}"
    assert jnp.allclose(out, ref32, atol=5e-2, rtol=5e-2), f"f32-ref max err {err32}"

    # Exercise a multi-tile batch too (>=2 grid steps path for v7x sharding).
    key, kx2 = jax.random.split(key)
    B2 = 300
    x2 = jax.random.normal(kx2, (B2, 40), jnp.float32)
    out2 = jax.block_until_ready(prediction_model2_forward(x2, params))
    ref2 = reference_forward_bf16(x2, params)
    assert out2.shape == (B2, 1)
    assert jnp.allclose(out2, ref2, atol=2e-3, rtol=2e-3), \
        f"multi-tile max err {jnp.max(jnp.abs(out2 - ref2))}"

    print("KERNEL_OK")
</pallas_src>

<mosaic_0001>
module attributes {stable_mosaic.version = 11 : i64} {
  func.func @_mlp_kernel(%arg0: i32, %arg1: memref<128x40xbf16, #tpu.memory_space<vmem>>, %arg2: memref<256x40xbf16, #tpu.memory_space<vmem>>, %arg3: memref<256x1xf32, #tpu.memory_space<vmem>>, %arg4: memref<128x256xbf16, #tpu.memory_space<vmem>>, %arg5: memref<128x1xf32, #tpu.memory_space<vmem>>, %arg6: memref<64x128xbf16, #tpu.memory_space<vmem>>, %arg7: memref<64x1xf32, #tpu.memory_space<vmem>>, %arg8: memref<32x64xbf16, #tpu.memory_space<vmem>>, %arg9: memref<32x1xf32, #tpu.memory_space<vmem>>, %arg10: memref<32x1xbf16, #tpu.memory_space<vmem>>, %arg11: memref<1x1xf32, #tpu.memory_space<vmem>>, %arg12: memref<1x128xf32, #tpu.memory_space<vmem>>) attributes {dimension_semantics = [#tpu.dimension_semantics<parallel>], iteration_bounds = array<i64: 1>, scalar_prefetch = 0 : i64, scratch_operands = 0 : i64, tpu.core_type = #tpu.core_type<tc>, window_params = [{transform_indices = @transform_0, window_bounds = array<i64: 128, 40>}, {pipeline_mode = #tpu.pipeline_mode<synchronous>, transform_indices = @transform_1, window_bounds = array<i64: 256, 40>}, {pipeline_mode = #tpu.pipeline_mode<synchronous>, transform_indices = @transform_2, window_bounds = array<i64: 256, 1>}, {pipeline_mode = #tpu.pipeline_mode<synchronous>, transform_indices = @transform_3, window_bounds = array<i64: 128, 256>}, {pipeline_mode = #tpu.pipeline_mode<synchronous>, transform_indices = @transform_4, window_bounds = array<i64: 128, 1>}, {pipeline_mode = #tpu.pipeline_mode<synchronous>, transform_indices = @transform_5, window_bounds = array<i64: 64, 128>}, {pipeline_mode = #tpu.pipeline_mode<synchronous>, transform_indices = @transform_6, window_bounds = array<i64: 64, 1>}, {pipeline_mode = #tpu.pipeline_mode<synchronous>, transform_indices = @transform_7, window_bounds = array<i64: 32, 64>}, {pipeline_mode = #tpu.pipeline_mode<synchronous>, transform_indices = @transform_8, window_bounds = array<i64: 32, 1>}, {pipeline_mode = #tpu.pipeline_mode<synchronous>, transform_indices = @transform_9, window_bounds = array<i64: 32, 1>}, {pipeline_mode = #tpu.pipeline_mode<synchronous>, transform_indices = @transform_10, window_bounds = array<i64: 1, 1>}, {transform_indices = @transform_11, window_bounds = array<i64: 1, 128>}]} {
    %c0 = arith.constant 0 : index
    %c0_0 = arith.constant 0 : index
    %0 = vector.load %arg1[%c0, %c0_0] : memref<128x40xbf16, #tpu.memory_space<vmem>>, vector<128x40xbf16>
    %c0_1 = arith.constant 0 : index
    %c0_2 = arith.constant 0 : index
    %1 = vector.load %arg2[%c0_1, %c0_2] : memref<256x40xbf16, #tpu.memory_space<vmem>>, vector<256x40xbf16>
    %cst = arith.constant dense<0.000000e+00> : vector<256x128xf32>
    %2 = tpu.matmul %1, %0, %cst {dimension_numbers = #tpu.dot_dimension_numbers<[1], [1], [0], [0], [0, 0, 1, 0], [], []>} : vector<256x40xbf16>, vector<128x40xbf16>, vector<256x128xf32> -> vector<256x128xf32>
    %c0_3 = arith.constant 0 : index
    %c0_4 = arith.constant 0 : index
    %3 = vector.load %arg3[%c0_3, %c0_4] : memref<256x1xf32, #tpu.memory_space<vmem>>, vector<256x1xf32>
    %4 = vector.broadcast %3 : vector<256x1xf32> to vector<256x128xf32>
    %5 = arith.addf %2, %4 : vector<256x128xf32>
    %cst_5 = arith.constant 0.000000e+00 : f32
    %6 = vector.broadcast %cst_5 : f32 to vector<256x128xf32>
    %7 = arith.maximumf %5, %6 : vector<256x128xf32>
    %8 = arith.truncf %7 : vector<256x128xf32> to vector<256x128xbf16>
    %c0_6 = arith.constant 0 : index
    %c0_7 = arith.constant 0 : index
    %9 = vector.load %arg4[%c0_6, %c0_7] : memref<128x256xbf16, #tpu.memory_space<vmem>>, vector<128x256xbf16>
    %cst_8 = arith.constant dense<0.000000e+00> : vector<128x128xf32>
    %10 = tpu.matmul %9, %8, %cst_8 {dimension_numbers = #tpu.dot_dimension_numbers<[1], [0], [0], [1], [0, 0, 1, 1], [], []>} : vector<128x256xbf16>, vector<256x128xbf16>, vector<128x128xf32> -> vector<128x128xf32>
    %c0_9 = arith.constant 0 : index
    %c0_10 = arith.constant 0 : index
    %11 = vector.load %arg5[%c0_9, %c0_10] : memref<128x1xf32, #tpu.memory_space<vmem>>, vector<128x1xf32>
    %12 = vector.broadcast %11 : vector<128x1xf32> to vector<128x128xf32>
    %13 = arith.addf %10, %12 : vector<128x128xf32>
    %cst_11 = arith.constant 0.000000e+00 : f32
    %14 = vector.broadcast %cst_11 : f32 to vector<128x128xf32>
    %15 = arith.maximumf %13, %14 : vector<128x128xf32>
    %16 = arith.truncf %15 : vector<128x128xf32> to vector<128x128xbf16>
    %c0_12 = arith.constant 0 : index
    %c0_13 = arith.constant 0 : index
    %17 = vector.load %arg6[%c0_12, %c0_13] : memref<64x128xbf16, #tpu.memory_space<vmem>>, vector<64x128xbf16>
    %cst_14 = arith.constant dense<0.000000e+00> : vector<64x128xf32>
    %18 = tpu.matmul %17, %16, %cst_14 {dimension_numbers = #tpu.dot_dimension_numbers<[1], [0], [0], [1], [0, 0, 1, 1], [], []>} : vector<64x128xbf16>, vector<128x128xbf16>, vector<64x128xf32> -> vector<64x128xf32>
    %c0_15 = arith.constant 0 : index
    %c0_16 = arith.constant 0 : index
    %19 = vector.load %arg7[%c0_15, %c0_16] : memref<64x1xf32, #tpu.memory_space<vmem>>, vector<64x1xf32>
    %20 = vector.broadcast %19 : vector<64x1xf32> to vector<64x128xf32>
    %21 = arith.addf %18, %20 : vector<64x128xf32>
    %cst_17 = arith.constant 0.000000e+00 : f32
    %22 = vector.broadcast %cst_17 : f32 to vector<64x128xf32>
    %23 = arith.maximumf %21, %22 : vector<64x128xf32>
    %24 = arith.truncf %23 : vector<64x128xf32> to vector<64x128xbf16>
    %c0_18 = arith.constant 0 : index
    %c0_19 = arith.constant 0 : index
    %25 = vector.load %arg8[%c0_18, %c0_19] : memref<32x64xbf16, #tpu.memory_space<vmem>>, vector<32x64xbf16>
    %cst_20 = arith.constant dense<0.000000e+00> : vector<32x128xf32>
    %26 = tpu.matmul %25, %24, %cst_20 {dimension_numbers = #tpu.dot_dimension_numbers<[1], [0], [0], [1], [0, 0, 1, 1], [], []>} : vector<32x64xbf16>, vector<64x128xbf16>, vector<32x128xf32> -> vector<32x128xf32>
    %c0_21 = arith.constant 0 : index
    %c0_22 = arith.constant 0 : index
    %27 = vector.load %arg9[%c0_21, %c0_22] : memref<32x1xf32, #tpu.memory_space<vmem>>, vector<32x1xf32>
    %28 = vector.broadcast %27 : vector<32x1xf32> to vector<32x128xf32>
    %29 = arith.addf %26, %28 : vector<32x128xf32>
    %cst_23 = arith.constant 0.000000e+00 : f32
    %30 = vector.broadcast %cst_23 : f32 to vector<32x128xf32>
    %31 = arith.maximumf %29, %30 : vector<32x128xf32>
    %32 = arith.truncf %31 : vector<32x128xf32> to vector<32x128xbf16>
    %c0_24 = arith.constant 0 : index
    %c0_25 = arith.constant 0 : index
    %33 = vector.load %arg10[%c0_24, %c0_25] : memref<32x1xbf16, #tpu.memory_space<vmem>>, vector<32x1xbf16>
    %34 = arith.extf %33 : vector<32x1xbf16> to vector<32x1xf32>
    %35 = arith.extf %32 : vector<32x128xbf16> to vector<32x128xf32>
    %36 = vector.broadcast %34 : vector<32x1xf32> to vector<32x128xf32>
    %37 = arith.mulf %36, %35 : vector<32x128xf32>
    %cst_26 = arith.constant dense<0.000000e+00> : vector<128xf32>
    %38 = vector.multi_reduction <add>, %37, %cst_26 [0] : vector<32x128xf32> to vector<128xf32>
    %39 = vector.shape_cast %38 : vector<128xf32> to vector<1x128xf32>
    %c0_27 = arith.constant 0 : index
    %c0_28 = arith.constant 0 : index
    %40 = vector.load %arg11[%c0_27, %c0_28] : memref<1x1xf32, #tpu.memory_space<vmem>>, vector<1x1xf32>
    %41 = vector.broadcast %40 : vector<1x1xf32> to vector<1x128xf32>
    %42 = arith.addf %39, %41 : vector<1x128xf32>
    %c0_29 = arith.constant 0 : index
    %c0_30 = arith.constant 0 : index
    %43 = vector.load %arg12[%c0_29, %c0_30] : memref<1x128xf32, #tpu.memory_space<vmem>>, vector<1x128xf32>
    tpu.vector_store %arg12[%c0_29, %c0_30], %42 {strides = array<i32>} : memref<1x128xf32, #tpu.memory_space<vmem>>, vector<1x128xf32>,
    return
  }
  func.func @transform_0(%arg0: i32) -> (i32, i32) {
    %c0_i32 = arith.constant 0 : i32
    %c0_i32_0 = arith.constant 0 : i32
    return %arg0, %c0_i32 : i32, i32
  }
  func.func @transform_1(%arg0: i32) -> (i32, i32) {
    %c0_i32 = arith.constant 0 : i32
    %c0_i32_0 = arith.constant 0 : i32
    %c0_i32_1 = arith.constant 0 : i32
    return %c0_i32, %c0_i32_0 : i32, i32
  }
  func.func @transform_2(%arg0: i32) -> (i32, i32) {
    %c0_i32 = arith.constant 0 : i32
    %c0_i32_0 = arith.constant 0 : i32
    %c0_i32_1 = arith.constant 0 : i32
    return %c0_i32, %c0_i32_0 : i32, i32
  }
  func.func @transform_3(%arg0: i32) -> (i32, i32) {
    %c0_i32 = arith.constant 0 : i32
    %c0_i32_0 = arith.constant 0 : i32
    %c0_i32_1 = arith.constant 0 : i32
    return %c0_i32, %c0_i32_0 : i32, i32
  }
  func.func @transform_4(%arg0: i32) -> (i32, i32) {
    %c0_i32 = arith.constant 0 : i32
    %c0_i32_0 = arith.constant 0 : i32
    %c0_i32_1 = arith.constant 0 : i32
    return %c0_i32, %c0_i32_0 : i32, i32
  }
  func.func @transform_5(%arg0: i32) -> (i32, i32) {
    %c0_i32 = arith.constant 0 : i32
    %c0_i32_0 = arith.constant 0 : i32
    %c0_i32_1 = arith.constant 0 : i32
    return %c0_i32, %c0_i32_0 : i32, i32
  }
  func.func @transform_6(%arg0: i32) -> (i32, i32) {
    %c0_i32 = arith.constant 0 : i32
    %c0_i32_0 = arith.constant 0 : i32
    %c0_i32_1 = arith.constant 0 : i32
    return %c0_i32, %c0_i32_0 : i32, i32
  }
  func.func @transform_7(%arg0: i32) -> (i32, i32) {
    %c0_i32 = arith.constant 0 : i32
    %c0_i32_0 = arith.constant 0 : i32
    %c0_i32_1 = arith.constant 0 : i32
    return %c0_i32, %c0_i32_0 : i32, i32
  }
  func.func @transform_8(%arg0: i32) -> (i32, i32) {
    %c0_i32 = arith.constant 0 : i32
    %c0_i32_0 = arith.constant 0 : i32
    %c0_i32_1 = arith.constant 0 : i32
    return %c0_i32, %c0_i32_0 : i32, i32
  }
  func.func @transform_9(%arg0: i32) -> (i32, i32) {
    %c0_i32 = arith.constant 0 : i32
    %c0_i32_0 = arith.constant 0 : i32
    %c0_i32_1 = arith.constant 0 : i32
    return %c0_i32, %c0_i32_0 : i32, i32
  }
  func.func @transform_10(%arg0: i32) -> (i32, i32) {
    %c0_i32 = arith.constant 0 : i32
    %c0_i32_0 = arith.constant 0 : i32
    %c0_i32_1 = arith.constant 0 : i32
    return %c0_i32, %c0_i32_0 : i32, i32
  }
  func.func @transform_11(%arg0: i32) -> (i32, i32) {
    %c0_i32 = arith.constant 0 : i32
    %c0_i32_0 = arith.constant 0 : i32
    return %c0_i32, %arg0 : i32, i32
  }
}

</mosaic_0001>

<bundles_post_ra>
// kernel: prediction_model2_forward.1
= control target key start
LH: loop header
LB: loop body
LE: loop exit
PB: predicated region body
PF: predicated region fallthrough
CT: control target
= control target key end

     0   :  { %vm401_vm0 = vcmask 326656   ;;  %v1647_v1 = vmov 0   ;;  %vm1191_vm1 = vcmask 523264   ;;  %s2144_s0 = inlined_call_operand.vmem [shape: bf16[128,40], index: 0, kind: input, shape index: {}]   ;;  %s2145_s2 = inlined_call_operand.vmem [shape: f32[256,1], index: 2, kind: input, shape index: {}]   ;;  %s2146_s10 = inlined_call_operand.<no memory space> [shape: f32[1,1], index: 10, kind: input, shape index: {}]   ;;  %s2147_s1 = inlined_call_operand.vmem [shape: bf16[256,40], index: 1, kind: input, shape index: {}]   ;;  %s2148_s4 = inlined_call_operand.vmem [shape: f32[128,1], index: 4, kind: input, shape index: {}]   ;;  %s2149_s6 = inlined_call_operand.vmem [shape: f32[64,1], index: 6, kind: input, shape index: {}]   ;;  %s2150_s8 = inlined_call_operand.vmem [shape: f32[32,1], index: 8, kind: input, shape index: {}]   ;;  %s2151_s9 = inlined_call_operand.vmem [shape: bf16[32,1], index: 9, kind: input, shape index: {}]   ;;  %s2152_s3 = inlined_call_operand.vmem [shape: bf16[128,256], index: 3, kind: input, shape index: {}]   ;;  %s2153_s5 = inlined_call_operand.vmem [shape: bf16[64,128], index: 5, kind: input, shape index: {}]   ;;  %s2154_s7 = inlined_call_operand.vmem [shape: bf16[32,64], index: 7, kind: input, shape index: {}]   ;;  %s2155_s11 = inlined_call_operand.vmem [shape: f32[1,128], index: 11, kind: output, shape index: {}]  }
   0x1   :  { %v1593_v0 = vld [vmem:[%s2144_s0] sm:$0xff]   ;;  %1587 = vset.pattern.permute.xlu1 %v1647_v1  ;;  %1586 = vset.pattern.permute.xlu0 %v1647_v1  ;;  %v1594_v2 = vld [vmem:[%s2144_s0 + $0x8] sm:$0xff]   ;;  %v16_v4 = vstv %s2146_s10  ;;  %v1595_v10 = vld [vmem:[%s2144_s0 + $0x10] sm:$0xff]  }
   0x2   :  { %1577 = vmatprep.subr.msk.bf16.mxu0 %vm401_vm0, %v1593_v0  ;;  %v451_v3 = vsel %vm401_vm0, %v1593_v0, 0  ;;  %17 = vst [vmem:[#allocation2] sm:$0x1] %v16_v4  ;;  %v105_v5 = vld [vmem:[%s2145_s2 + $0x80] sm:$0xff]  ;;  %v106_v7 = vld [vmem:[%s2145_s2 + $0x88] sm:$0xff]  ;;  %v454_v9 = vsel %vm401_vm0, %v1594_v2, 0 }
   0x3   :  { %1494 = vmatpush3.bf16.xpose.msra.mxu0 %v451_v3  ;;  %v89_v6 = vld [vmem:[%s2145_s2] sm:$0xff]  ;;  %203 = vperm.xlu0 %1586, %v105_v5   ;;  %v90_v8 = vld [vmem:[%s2145_s2 + $0x8] sm:$0xff]  ;;  %v107_v11 = vld [vmem:[%s2145_s2 + $0x90] sm:$0xff]  ;;  %v457_v16 = vsel %vm401_vm0, %v1595_v10, 0 }
   0x4   :  { %1578 = vmatprep.subr.msk.bf16.mxu0 %vm401_vm0, %v1594_v2  ;;  %123 = vperm.xlu1 %1587, %v89_v6   ;;  %v108_v12 = vld [vmem:[%s2145_s2 + $0x98] sm:$0xff]  ;;  %v91_v13 = vld [vmem:[%s2145_s2 + $0x10] sm:$0xff]  ;;  %v1601_v15 = vld [vmem:[%s2147_s1] sm:$0xff]  }
   0x5   :  { %v92_v14 = vld [vmem:[%s2145_s2 + $0x18] sm:$0xff]  ;;  %1509 = vmatprep.mubr.msk.bf16.mxu0 %vm401_vm0, %v1601_v15  ;;  %v109_v18 = vld [vmem:[%s2145_s2 + $0xa0] sm:$0xff]  ;;  %v110_v19 = vld [vmem:[%s2145_s2 + $0xa8] sm:$0xff] }
   0x6   :  { %v1596_v17 = vld [vmem:[%s2144_s0 + $0x18] sm:$0xff]   ;;  %v93_v20 = vld [vmem:[%s2145_s2 + $0x20] sm:$0xff]  ;;  %v94_v21 = vld [vmem:[%s2145_s2 + $0x28] sm:$0xff] }
   0x7   :  { %208 = vperm.xlu0 %1586, %v106_v7   ;;  %v460_v22 = vsel %vm401_vm0, %v1596_v17, 0  ;;  %v1597_v23 = vld [vmem:[%s2144_s0 + $0x20] sm:$0xff]   ;;  %v111_v24 = vld [vmem:[%s2145_s2 + $0xb0] sm:$0xff]  ;;  %v112_v25 = vld [vmem:[%s2145_s2 + $0xb8] sm:$0xff] }
   0x8   :  { %128 = vperm.xlu1 %1587, %v90_v8   ;;  %v95_v26 = vld [vmem:[%s2145_s2 + $0x30] sm:$0xff]  ;;  %v96_v27 = vld [vmem:[%s2145_s2 + $0x38] sm:$0xff]  ;;  %v463_v28 = vsel %vm401_vm0, %v1597_v23, 0  ;;  %v1598_v29 = vld [vmem:[%s2144_s0 + $0x28] sm:$0xff]  }
   0x9   :  { %v113_v30 = vld [vmem:[%s2145_s2 + $0xc0] sm:$0xff]  ;;  %v114_v31 = vld [vmem:[%s2145_s2 + $0xc8] sm:$0xff]  ;;  %v466_v34 = vsel %vm401_vm0, %v1598_v29, 0  ;;  %v1599_v35 = vld [vmem:[%s2144_s0 + $0x30] sm:$0xff]  }
   0xa   :  { %v97_v32 = vld [vmem:[%s2145_s2 + $0x40] sm:$0xff]  ;;  %v98_v33 = vld [vmem:[%s2145_s2 + $0x48] sm:$0xff]  ;;  %v115_v36 = vld [vmem:[%s2145_s2 + $0xd0] sm:$0xff]  ;;  %v469_v40 = vsel %vm401_vm0, %v1599_v35, 0 }
   0xb   :  { %1496 = vmatpush3.bf16.xpose.msra.mxu0 %v454_v9  ;;  %213 = vperm.xlu0 %1586, %v107_v11   ;;  %v116_v37 = vld [vmem:[%s2145_s2 + $0xd8] sm:$0xff]  ;;  %v99_v38 = vld [vmem:[%s2145_s2 + $0x50] sm:$0xff]  ;;  %v117_v42 = vld [vmem:[%s2145_s2 + $0xe0] sm:$0xff] }
   0xc   :  { %1579 = vmatprep.subr.msk.bf16.mxu0 %vm401_vm0, %v1595_v10  ;;  %218 = vperm.xlu1 %1587, %v108_v12   ;;  %v100_v39 = vld [vmem:[%s2145_s2 + $0x58] sm:$0xff]  ;;  %v118_v43 = vld [vmem:[%s2145_s2 + $0xe8] sm:$0xff]  ;;  %v101_v44 = vld [vmem:[%s2145_s2 + $0x60] sm:$0xff] }
   0xd   :  { %v1600_v41 = vld [vmem:[%s2144_s0 + $0x38] sm:$0xff]   ;;  %v102_v45 = vld [vmem:[%s2145_s2 + $0x68] sm:$0xff]  ;;  %v119_v47 = vld [vmem:[%s2145_s2 + $0xf0] sm:$0xff] }
   0xe   :  { %v472_v46 = vsel %vm401_vm0, %v1600_v41, 0  ;;  %v120_v48 = vld [vmem:[%s2145_s2 + $0xf8] sm:$0xff]  ;;  %v1602_v49 = vld [vmem:[%s2147_s1 + $0x8] sm:$0xff]   ;;  %v103_v50 = vld [vmem:[%s2145_s2 + $0x70] sm:$0xff] }
   0xf   :  { %133 = vperm.xlu0 %1586, %v91_v13   ;;  %v104_v51 = vld [vmem:[%s2145_s2 + $0x78] sm:$0xff]  ;;  %v1603_v52 = vld [vmem:[%s2147_s1 + $0x10] sm:$0xff]   ;;  %v699_v53 = vld [vmem:[%s2148_s4] sm:$0xff] }
  0x10   :  { %138 = vperm.xlu1 %1587, %v92_v14   ;;  %v700_v54 = vld [vmem:[%s2148_s4 + $0x8] sm:$0xff]  ;;  %v1604_v55 = vld [vmem:[%s2147_s1 + $0x18] sm:$0xff]   ;;  %v701_v56 = vld [vmem:[%s2148_s4 + $0x10] sm:$0xff] }
  0x11   :  { %v702_v57 = vld [vmem:[%s2148_s4 + $0x18] sm:$0xff]  ;;  %v1605_v58 = vld [vmem:[%s2147_s1 + $0x20] sm:$0xff]   ;;  %v704_v60 = vld [vmem:[%s2148_s4 + $0x28] sm:$0xff] }
  0x12   :  { %v703_v59 = vld [vmem:[%s2148_s4 + $0x20] sm:$0xff]  ;;  %v1606_v61 = vld [vmem:[%s2147_s1 + $0x28] sm:$0xff]   ;;  %v705_v62 = vld [vmem:[%s2148_s4 + $0x30] sm:$0xff] }
  0x13   :  { %1498 = vmatpush3.bf16.xpose.msra.mxu0 %v457_v16  ;;  %223 = vperm.xlu0 %1586, %v109_v18   ;;  %v706_v63 = vld [vmem:[%s2148_s4 + $0x38] sm:$0xff]  ;;  %v1607_v0 = vld [vmem:[%s2147_s1 + $0x30] sm:$0xff]   ;;  %v707_v1 = vld [vmem:[%s2148_s4 + $0x40] sm:$0xff] }
  0x14   :  { %1580 = vmatprep.subr.msk.bf16.mxu0 %vm401_vm0, %v1596_v17  ;;  %228 = vperm.xlu1 %1587, %v110_v19   ;;  %v708_v2 = vld [vmem:[%s2148_s4 + $0x48] sm:$0xff]  ;;  %v1608_v3 = vld [vmem:[%s2147_s1 + $0x38] sm:$0xff]   ;;  %v709_v4 = vld [vmem:[%s2148_s4 + $0x50] sm:$0xff] }
  0x15   :  { %v710_v5 = vld [vmem:[%s2148_s4 + $0x58] sm:$0xff]  ;;  %v1609_v6 = vld [vmem:[%s2147_s1 + $0x40] sm:$0xff]   ;;  %v712_v8 = vld [vmem:[%s2148_s4 + $0x68] sm:$0xff] }
  0x16   :  { %v711_v7 = vld [vmem:[%s2148_s4 + $0x60] sm:$0xff]  ;;  %v1610_v9 = vld [vmem:[%s2147_s1 + $0x48] sm:$0xff]   ;;  %v713_v10 = vld [vmem:[%s2148_s4 + $0x70] sm:$0xff] }
  0x17   :  { %143 = vperm.xlu0 %1586, %v93_v20   ;;  %v714_v11 = vld [vmem:[%s2148_s4 + $0x78] sm:$0xff]  ;;  %v1611_v12 = vld [vmem:[%s2147_s1 + $0x50] sm:$0xff]   ;;  %v1004_v13 = vld [vmem:[%s2149_s6] sm:$0xff] }
  0x18   :  { %148 = vperm.xlu1 %1587, %v94_v21   ;;  %v1005_v14 = vld [vmem:[%s2149_s6 + $0x8] sm:$0xff]  ;;  %v1612_v15 = vld [vmem:[%s2147_s1 + $0x58] sm:$0xff]   ;;  %v1006_v16 = vld [vmem:[%s2149_s6 + $0x10] sm:$0xff] }
  0x19   :  { %v1007_v17 = vld [vmem:[%s2149_s6 + $0x18] sm:$0xff]  ;;  %v1613_v18 = vld [vmem:[%s2147_s1 + $0x60] sm:$0xff]   ;;  %v1009_v20 = vld [vmem:[%s2149_s6 + $0x28] sm:$0xff] }
  0x1a   :  { %v1008_v19 = vld [vmem:[%s2149_s6 + $0x20] sm:$0xff]  ;;  %v1614_v21 = vld [vmem:[%s2147_s1 + $0x68] sm:$0xff]  }
  0x1b   :  { %1500 = vmatpush3.bf16.xpose.msra.mxu0 %v460_v22  ;;  %233 = vperm.xlu0 %1586, %v111_v24   ;;  %v1010_v22 = vld [vmem:[%s2149_s6 + $0x30] sm:$0xff] }
  0x1c   :  { %1581 = vmatprep.subr.msk.bf16.mxu0 %vm401_vm0, %v1597_v23  ;;  %238 = vperm.xlu1 %1587, %v112_v25   ;;  %v1011_v23 = vld [vmem:[%s2149_s6 + $0x38] sm:$0xff]  ;;  %v1615_v24 = vld [vmem:[%s2147_s1 + $0x70] sm:$0xff]   ;;  %v1157_v25 = vld [vmem:[%s2150_s8] sm:$0xff] }
  0x1f   :  { %153 = vperm.xlu0 %1586, %v95_v26   ;;  %v1158_v26 = vld [vmem:[%s2150_s8 + $0x8] sm:$0xff] }
  0x20   :  { %158 = vperm.xlu1 %1587, %v96_v27   ;;  %v1379_v27 = vld [vmem:[%s2151_s9] sm:$0xff]  }
  0x23   :  { %1502 = vmatpush3.bf16.xpose.msra.mxu0 %v463_v28  ;;  %243 = vperm.xlu0 %1586, %v113_v30   ;;  %v1616_v28 = vld [vmem:[%s2147_s1 + $0x78] sm:$0xff]   ;;  %v1381_v30 = vunpack.c.h.bf16 %v1379_v27 }
  0x24   :  { %1582 = vmatprep.subr.msk.bf16.mxu0 %vm401_vm0, %v1598_v29  ;;  %248 = vperm.xlu1 %1587, %v114_v31   ;;  %v1380_v29 = vunpack.c.l.bf16 %v1379_v27  ;;  %v1159_v31 = vld [vmem:[%s2150_s8 + $0x10] sm:$0xff] }
  0x27   :  { %163 = vperm.xlu0 %1586, %v97_v32   ;;  %v1160_v32 = vld [vmem:[%s2150_s8 + $0x18] sm:$0xff] }
  0x28   :  { %168 = vperm.xlu1 %1587, %v98_v33   ;;  %v1386_v33 = vld [vmem:[%s2151_s9 + $0x8] sm:$0xff]  }
  0x2b   :  { %1504 = vmatpush3.bf16.xpose.msra.mxu0 %v466_v34  ;;  %253 = vperm.xlu0 %1586, %v115_v36   ;;  %v1588_v34 = vpack.i.bf16 %v1381_v30, %v1380_v29  ;;  %v1385_v36 = vunpack.c.h.bf16 %v1386_v33 }
  0x2c   :  { %1583 = vmatprep.subr.msk.bf16.mxu0 %vm401_vm0, %v1599_v35  ;;  %258 = vperm.xlu1 %1587, %v116_v37   ;;  %v1384_v35 = vunpack.c.l.bf16 %v1386_v33  ;;  %v1298_v37 = vld [vmem:[#allocation2] sm:$0x1] }
  0x2f   :  { %173 = vperm.xlu0 %1586, %v99_v38  }
  0x30   :  { %178 = vperm.xlu1 %1587, %v100_v39  }
  0x33   :  { %1506 = vmatpush3.bf16.xpose.msra.mxu0 %v469_v40  ;;  %263 = vperm.xlu0 %1586, %v117_v42   ;;  %v1619_v42 = vld [vmem:[%s2152_s3 + $0x4] ss:$8 sps:$4 sm:$0xff]  }
  0x34   :  { %1584 = vmatprep.subr.msk.bf16.mxu0 %vm401_vm0, %v1600_v41  ;;  %268 = vperm.xlu1 %1587, %v118_v43  }
  0x35   :  { %907 = vmatprep.mubr.bf16.mxu1 %v1619_v42 }
  0x37   :  { %183 = vperm.xlu0 %1586, %v101_v44  }
  0x38   :  { %188 = vperm.xlu1 %1587, %v102_v45  }
  0x3b   :  { %1508 = vmatpush3.bf16.xpose.msra.mxu0 %v472_v46  ;;  %273 = vperm.xlu0 %1586, %v119_v47  }
  0x3c   :  { %278 = vperm.xlu1 %1587, %v120_v48  }
  0x3f   :  { %193 = vperm.xlu0 %1586, %v103_v50  }
  0x40   :  { %198 = vperm.xlu1 %1587, %v104_v51  }
  0x42   :  { %1510 = vmatmul.mubr.msk.bf16.vlgmr.msra.gmra.mrb[0].mxu0 %vm401_vm0, %v1602_v49 }
  0x43   :  { %1513 = vmatprep.mubr.msk.bf16.mxu0 %vm401_vm0, %v1603_v52  ;;  %717 = vperm.xlu0 %1586, %v699_v53  }
  0x44   :  { %722 = vperm.xlu1 %1587, %v700_v54  }
  0x47   :  { %727 = vperm.xlu0 %1586, %v701_v56  }
  0x48   :  { %732 = vperm.xlu1 %1587, %v702_v57  }
  0x4a   :  { %1514 = vmatmul.mubr.msk.bf16.gmra.mrb[4].mxu0 %vm401_vm0, %v1604_v55 }
  0x4b   :  { %1517 = vmatprep.mubr.msk.bf16.mxu0 %vm401_vm0, %v1605_v58  ;;  %737 = vperm.xlu0 %1586, %v703_v59  }
  0x4c   :  { %742 = vperm.xlu1 %1587, %v704_v60  }
  0x4f   :  { %747 = vperm.xlu0 %1586, %v705_v62  }
  0x50   :  { %752 = vperm.xlu1 %1587, %v706_v63  }
  0x52   :  { %1518 = vmatmul.mubr.msk.bf16.gmra.mrb[8].mxu0 %vm401_vm0, %v1606_v61 }
  0x53   :  { %1521 = vmatprep.mubr.msk.bf16.mxu0 %vm401_vm0, %v1607_v0  ;;  %757 = vperm.xlu0 %1586, %v707_v1  }
  0x54   :  { %762 = vperm.xlu1 %1587, %v708_v2  }
  0x57   :  { %767 = vperm.xlu0 %1586, %v709_v4  }
  0x58   :  { %772 = vperm.xlu1 %1587, %v710_v5  }
  0x5a   :  { %1522 = vmatmul.mubr.msk.bf16.gmra.mrb[12].mxu0 %vm401_vm0, %v1608_v3 }
  0x5b   :  { %1525 = vmatprep.mubr.msk.bf16.mxu0 %vm401_vm0, %v1609_v6  ;;  %777 = vperm.xlu0 %1586, %v711_v7  }
  0x5c   :  { %782 = vperm.xlu1 %1587, %v712_v8  }
  0x5f   :  { %787 = vperm.xlu0 %1586, %v713_v10  }
  0x60   :  { %792 = vperm.xlu1 %1587, %v714_v11  }
  0x62   :  { %1526 = vmatmul.mubr.msk.bf16.gmra.mrb[16].mxu0 %vm401_vm0, %v1610_v9 }
  0x63   :  { %1529 = vmatprep.mubr.msk.bf16.mxu0 %vm401_vm0, %v1611_v12  ;;  %1014 = vperm.xlu0 %1586, %v1004_v13  }
  0x64   :  { %1019 = vperm.xlu1 %1587, %v1005_v14  }
  0x67   :  { %1024 = vperm.xlu0 %1586, %v1006_v16  }
  0x68   :  { %1029 = vperm.xlu1 %1587, %v1007_v17  }
  0x6a   :  { %1530 = vmatmul.mubr.msk.bf16.gmra.mrb[20].mxu0 %vm401_vm0, %v1612_v15 }
  0x6b   :  { %1533 = vmatprep.mubr.msk.bf16.mxu0 %vm401_vm0, %v1613_v18  ;;  %1034 = vperm.xlu0 %1586, %v1008_v19  }
  0x6c   :  { %1039 = vperm.xlu1 %1587, %v1009_v20  }
  0x6f   :  { %1044 = vperm.xlu0 %1586, %v1010_v22  }
  0x70   :  { %1049 = vperm.xlu1 %1587, %v1011_v23  }
  0x72   :  { %1534 = vmatmul.mubr.msk.bf16.gmra.mrb[24].mxu0 %vm401_vm0, %v1614_v21 }
  0x73   :  { %1537 = vmatprep.mubr.msk.bf16.mxu0 %vm401_vm0, %v1615_v24  ;;  %1163 = vperm.xlu0 %1586, %v1157_v25  }
  0x74   :  { %1168 = vperm.xlu1 %1587, %v1158_v26  }
  0x77   :  { %1173 = vperm.xlu0 %1586, %v1159_v31  }
  0x78   :  { %1178 = vperm.xlu1 %1587, %v1160_v32  }
  0x7a   :  { %1538 = vmatmul.mubr.msk.bf16.gmra.mrb[28].mxu0 %vm401_vm0, %v1616_v28 }
  0x7b   :  { %1589 = vperm.xlu0 %1586, %v1588_v34  }
  0x7c   :  { %1277 = vperm.xlu1 %1587, %v1384_v35  }
  0x7f   :  { %1282 = vperm.xlu0 %1586, %v1385_v36  }
  0x80   :  { %1301 = vperm.xlu1 %1587, %v1298_v37  }
  0x82   :  { %v2001_v38 = vpop.permute.xlu0 %203 }
  0x83   :  { %v124_v39 = vpop.permute.xlu1 %123 }
  0x86   :  { %v2003_v40 = vpop.permute.xlu0 %208 }
  0x87   :  { %v129_v41 = vpop.permute.xlu1 %128 }
  0x8a   :  { %v2008_v43 = vpop.permute.xlu0 %213 }
  0x8b   :  { %v2010_v44 = vpop.permute.xlu1 %218 }
  0x8e   :  { %v134_v45 = vpop.permute.xlu0 %133 }
  0x8f   :  { %v139_v46 = vpop.permute.xlu1 %138 }
  0x92   :  { %v2012_v47 = vpop.permute.xlu0 %223 }
  0x93   :  { %v2014_v48 = vpop.permute.xlu1 %228 }
  0x96   :  { %v144_v49 = vpop.permute.xlu0 %143 }
  0x97   :  { %v149_v50 = vpop.permute.xlu1 %148 }
  0x9a   :  { %v2016_v51 = vpop.permute.xlu0 %233 }
  0x9b   :  { %v2018_v52 = vpop.permute.xlu1 %238 }
  0x9e   :  { %v154_v53 = vpop.permute.xlu0 %153 }
  0x9f   :  { %v159_v54 = vpop.permute.xlu1 %158 }
  0xa2   :  { %v2020_v55 = vpop.permute.xlu0 %243 }
  0xa3   :  { %v2022_v56 = vpop.permute.xlu1 %248 }
  0xa6   :  { %v164_v57 = vpop.permute.xlu0 %163 }
  0xa7   :  { %v169_v58 = vpop.permute.xlu1 %168 }
  0xaa   :  { %v2024_v59 = vpop.permute.xlu0 %253 }
  0xab   :  { %v2026_v60 = vpop.permute.xlu1 %258 }
  0xae   :  { %v174_v61 = vpop.permute.xlu0 %173 }
  0xaf   :  { %v179_v1 = vpop.permute.xlu1 %178 }
  0xb2   :  { %v2028_v9 = vpop.permute.xlu0 %263 }
  0xb3   :  { %v2032_v13 = vpop.permute.xlu1 %268 }
  0xb6   :  { %v184_v22 = vpop.permute.xlu0 %183 }
  0xb7   :  { %v189_v26 = vpop.permute.xlu1 %188 }
  0xba   :  { %v2040_v34 = vpop.permute.xlu0 %273 }
 0x115   :  { %v1511_v62 = vpop.f32.mrb[0].mxu0 }
 0x116   :  { %v517_v63 = vadd.f32 %v1511_v62, %v134_v45  ;;  %v508_v0 = vpop.f32.mrb[1].mxu0 }
 0x117   :  { %v509_v2 = vadd.f32 %v508_v0, %v124_v39  ;;  %v1512_v3 = vpop.f32.mrb[2].mxu0 }
 0x118   :  { %v520_v4 = vadd.f32 %v1512_v3, %v139_v46  ;;  %v511_v5 = vpop.f32.mrb[3].mxu0  ;;  %v637_v7 = vmax.f32 %v517_v63, 0.0 }
 0x119   :  { %v512_v6 = vadd.f32 %v511_v5, %v129_v41  ;;  %v635_v10 = vmax.f32 %v509_v2, 0.0  ;;  %v2042_v41 = vpop.permute.xlu1 %278 }
 0x11a   :  { %v638_v8 = vmax.f32 %v520_v4, 0.0 }
 0x11b   :  { %v636_v11 = vmax.f32 %v512_v6, 0.0 }
 0x11c   :  { %v2030_v12 = vpack.c.bf16 %v638_v8, %v637_v7 }
 0x11d   :  { %v1515_v14 = vpop.f32.mrb[4].mxu0  ;;  %v2034_v15 = vpack.c.bf16 %v636_v11, %v635_v10  ;;  %v199_v2 = vpop.permute.xlu1 %198 }
 0x11e   :  { %v533_v16 = vadd.f32 %v1515_v14, %v154_v53  ;;  %v524_v17 = vpop.f32.mrb[5].mxu0 }
 0x11f   :  { %v525_v18 = vadd.f32 %v524_v17, %v144_v49  ;;  %v1516_v19 = vpop.f32.mrb[6].mxu0 }
 0x120   :  { %v536_v20 = vadd.f32 %v1516_v19, %v159_v54  ;;  %v527_v21 = vpop.f32.mrb[7].mxu0  ;;  %v641_v24 = vmax.f32 %v533_v16, 0.0  ;;  %v194_v54 = vpop.permute.xlu0 %193 }
 0x121   :  { %v528_v23 = vadd.f32 %v527_v21, %v149_v50  ;;  %v639_v27 = vmax.f32 %v525_v18, 0.0 }
 0x122   :  { %v642_v25 = vmax.f32 %v536_v20, 0.0 }
 0x123   :  { %v640_v28 = vmax.f32 %v528_v23, 0.0 }
 0x124   :  { %v2036_v29 = vpack.c.bf16 %v642_v25, %v641_v24 }
 0x125   :  { %v2038_v30 = vpack.c.bf16 %v640_v28, %v639_v27  ;;  %v1519_v31 = vpop.f32.mrb[8].mxu0 }
 0x126   :  { %v549_v32 = vadd.f32 %v1519_v31, %v174_v61  ;;  %v540_v33 = vpop.f32.mrb[9].mxu0 }
 0x127   :  { %v541_v35 = vadd.f32 %v540_v33, %v164_v57  ;;  %v1520_v36 = vpop.f32.mrb[10].mxu0 }
 0x128   :  { %v552_v37 = vadd.f32 %v1520_v36, %v179_v1  ;;  %v543_v39 = vpop.f32.mrb[11].mxu0  ;;  %v645_v45 = vmax.f32 %v549_v32, 0.0 }
 0x129   :  { %v544_v42 = vadd.f32 %v543_v39, %v169_v58  ;;  %v643_v49 = vmax.f32 %v541_v35, 0.0 }
 0x12a   :  { %v646_v46 = vmax.f32 %v552_v37, 0.0 }
 0x12b   :  { %v644_v50 = vmax.f32 %v544_v42, 0.0 }
 0x12c   :  { %v2044_v53 = vpack.c.bf16 %v646_v46, %v645_v45 }
 0x12d   :  { %v2046_v62 = vpack.c.bf16 %v644_v50, %v643_v49  ;;  %v1523_v61 = vpop.f32.mrb[12].mxu0 }
 0x12e   :  { %v565_v63 = vadd.f32 %v1523_v61, %v194_v54  ;;  %v556_v0 = vpop.f32.mrb[13].mxu0 }
 0x12f   :  { %v557_v57 = vadd.f32 %v556_v0, %v184_v22  ;;  %v1524_v3 = vpop.f32.mrb[14].mxu0 }
 0x130   :  { %v568_v1 = vadd.f32 %v1524_v3, %v199_v2  ;;  %v559_v4 = vpop.f32.mrb[15].mxu0  ;;  %v649_v6 = vmax.f32 %v565_v63, 0.0 }
 0x131   :  { %v560_v5 = vadd.f32 %v559_v4, %v189_v26  ;;  %v647_v7 = vmax.f32 %v557_v57, 0.0 }
 0x132   :  { %v650_v58 = vmax.f32 %v568_v1, 0.0 }
 0x133   :  { %v648_v8 = vmax.f32 %v560_v5, 0.0 }
 0x134   :  { %v2048_v10 = vpack.c.bf16 %v650_v58, %v649_v6 }
 0x135   :  { %v2050_v11 = vpack.c.bf16 %v648_v8, %v647_v7  ;;  %v1527_v14 = vpop.f32.mrb[16].mxu0  ;;  %v1626_v8 = vld [vmem:[%s2152_s3 + $0x34] ss:$8 sps:$4 sm:$0xff]  }
 0x136   :  { %v581_v16 = vadd.f32 %v1527_v14, %v2008_v43  ;;  %v572_v17 = vpop.f32.mrb[17].mxu0  ;;  %v1631_v14 = vld [vmem:[%s2152_s3 + $0x40] ss:$8 sps:$4 sm:$0xff]  }
 0x137   :  { %v573_v18 = vadd.f32 %v572_v17, %v2001_v38  ;;  %v1528_v19 = vpop.f32.mrb[18].mxu0  ;;  %v1634_v17 = vld [vmem:[%s2152_s3 + $0x50] ss:$8 sps:$4 sm:$0xff]  }
 0x138   :  { %v584_v20 = vadd.f32 %v1528_v19, %v2010_v44  ;;  %v575_v21 = vpop.f32.mrb[19].mxu0  ;;  %v653_v23 = vmax.f32 %v581_v16, 0.0  ;;  %v1632_v16 = vld [vmem:[%s2152_s3 + $0x54] ss:$8 sps:$4 sm:$0xff]   ;;  %v1637_v19 = vld [vmem:[%s2152_s3 + $0x60] ss:$8 sps:$4 sm:$0xff]  }
 0x139   :  { %v576_v22 = vadd.f32 %v575_v21, %v2003_v40  ;;  %v651_v25 = vmax.f32 %v573_v18, 0.0  ;;  %v1635_v18 = vld [vmem:[%s2152_s3 + $0x64] ss:$8 sps:$4 sm:$0xff]   ;;  %v1640_v21 = vld [vmem:[%s2152_s3 + $0x70] ss:$8 sps:$4 sm:$0xff]  }
 0x13a   :  { %v654_v24 = vmax.f32 %v584_v20, 0.0  ;;  %v1638_v20 = vld [vmem:[%s2152_s3 + $0x74] ss:$8 sps:$4 sm:$0xff]  }
 0x13b   :  { %v652_v26 = vmax.f32 %v576_v22, 0.0  ;;  %v1641_v22 = vld [vmem:[%s2153_s5] sm:$0xff]  }
 0x13c   :  { %v676_v27 = vpack.c.bf16 %v654_v24, %v653_v23 }
 0x13d   :  { %v1531_v28 = vpop.f32.mrb[20].mxu0  ;;  %v675_v31 = vpack.c.bf16 %v652_v26, %v651_v25 }
 0x13e   :  { %v597_v32 = vadd.f32 %v1531_v28, %v2016_v51  ;;  %v588_v33 = vpop.f32.mrb[21].mxu0 }
 0x13f   :  { %v589_v43 = vadd.f32 %v588_v33, %v2012_v47  ;;  %v1532_v35 = vpop.f32.mrb[22].mxu0  ;;  %1411 = vmatprep.subr.bf16.mxu1 %v675_v31  ;;  %v723_v33 = vpop.permute.xlu1 %722 }
 0x140   :  { %v600_v38 = vadd.f32 %v1532_v35, %v2018_v52  ;;  %v591_v44 = vpop.f32.mrb[23].mxu0  ;;  %1412 = vmatpush3.bf16.msra.mxu1 %v2034_v15  ;;  %v657_v36 = vmax.f32 %v597_v32, 0.0 }
 0x141   :  { %v592_v40 = vadd.f32 %v591_v44, %v2014_v48  ;;  %1413 = vmatprep.subr.bf16.mxu1 %v676_v27  ;;  %v655_v39 = vmax.f32 %v589_v43, 0.0  ;;  %v718_v27 = vpop.permute.xlu0 %717 }
 0x142   :  { %v658_v37 = vmax.f32 %v600_v38, 0.0 }
 0x143   :  { %v656_v42 = vmax.f32 %v592_v40, 0.0 }
 0x144   :  { %v678_v45 = vpack.c.bf16 %v658_v37, %v657_v36  ;;  %1414 = vmatpush3.bf16.msra.mxu1 %v2030_v12 }
 0x145   :  { %v677_v51 = vpack.c.bf16 %v656_v42, %v655_v39  ;;  %v1535_v46 = vpop.f32.mrb[24].mxu0  ;;  %v728_v42 = vpop.permute.xlu0 %727 }
 0x146   :  { %v613_v47 = vadd.f32 %v1535_v46, %v2024_v59  ;;  %v604_v49 = vpop.f32.mrb[25].mxu0 }
 0x147   :  { %v605_v52 = vadd.f32 %v604_v49, %v2020_v55  ;;  %v1536_v50 = vpop.f32.mrb[26].mxu0  ;;  %1415 = vmatprep.subr.bf16.mxu1 %v677_v51 }
 0x148   :  { %v616_v15 = vadd.f32 %v1536_v50, %v2026_v60  ;;  %v607_v48 = vpop.f32.mrb[27].mxu0  ;;  %1416 = vmatpush3.bf16.msra.mxu1 %v2038_v30  ;;  %v661_v61 = vmax.f32 %v613_v47, 0.0  ;;  %v733_v47 = vpop.permute.xlu1 %732 }
 0x149   :  { %v608_v54 = vadd.f32 %v607_v48, %v2022_v56  ;;  %1417 = vmatprep.subr.bf16.mxu1 %v678_v45  ;;  %v659_v12 = vmax.f32 %v605_v52, 0.0 }
 0x14a   :  { %v662_v63 = vmax.f32 %v616_v15, 0.0 }
 0x14b   :  { %v660_v0 = vmax.f32 %v608_v54, 0.0 }
 0x14c   :  { %v680_v2 = vpack.c.bf16 %v662_v63, %v661_v61  ;;  %1418 = vmatpush3.bf16.msra.mxu1 %v2036_v29 }
 0x14d   :  { %v679_v59 = vpack.c.bf16 %v660_v0, %v659_v12  ;;  %v1539_v57 = vpop.f32.mrb[28].mxu0  ;;  %v738_v12 = vpop.permute.xlu0 %737 }
 0x14e   :  { %v629_v55 = vadd.f32 %v1539_v57, %v2040_v34  ;;  %v620_v3 = vpop.f32.mrb[29].mxu0  ;;  %v743_v57 = vpop.permute.xlu1 %742 }
 0x14f   :  { %v621_v60 = vadd.f32 %v620_v3, %v2028_v9  ;;  %v1540_v1 = vpop.f32.mrb[30].mxu0  ;;  %1419 = vmatprep.subr.bf16.mxu1 %v679_v59  ;;  %v1617_v9 = vld [vmem:[%s2152_s3] ss:$8 sps:$4 sm:$0xff]  }
 0x150   :  { %v632_v30 = vadd.f32 %v1540_v1, %v2042_v41  ;;  %v623_v56 = vpop.f32.mrb[31].mxu0  ;;  %1420 = vmatpush3.bf16.msra.mxu1 %v2046_v62  ;;  %v665_v5 = vmax.f32 %v629_v55, 0.0  ;;  %v1622_v41 = vld [vmem:[%s2152_s3 + $0x10] ss:$8 sps:$4 sm:$0xff]   ;;  %v1625_v62 = vld [vmem:[%s2152_s3 + $0x20] ss:$8 sps:$4 sm:$0xff]  }
 0x151   :  { %v624_v4 = vadd.f32 %v623_v56, %v2032_v13  ;;  %1421 = vmatprep.subr.bf16.mxu1 %v680_v2  ;;  %v663_v29 = vmax.f32 %v621_v60, 0.0  ;;  %v1620_v13 = vld [vmem:[%s2152_s3 + $0x14] ss:$8 sps:$4 sm:$0xff]  }
 0x152   :  { %v666_v6 = vmax.f32 %v632_v30, 0.0 }
 0x153   :  { %v664_v58 = vmax.f32 %v624_v4, 0.0 }
 0x154   :  { %v682_v7 = vpack.c.bf16 %v666_v6, %v665_v5  ;;  %1422 = vmatpush3.bf16.msra.mxu1 %v2044_v53  ;;  %v1623_v53 = vld [vmem:[%s2152_s3 + $0x24] ss:$8 sps:$4 sm:$0xff]   ;;  %v748_v6 = vpop.permute.xlu0 %747 }
 0x155   :  { %v681_v34 = vpack.c.bf16 %v664_v58, %v663_v29 }
 0x157   :  { %1423 = vmatprep.subr.bf16.mxu1 %v681_v34  ;;  %v753_v34 = vpop.permute.xlu1 %752 }
 0x158   :  { %1424 = vmatpush3.bf16.msra.mxu1 %v2050_v11  ;;  %v1629_v11 = vld [vmem:[%s2152_s3 + $0x44] ss:$8 sps:$4 sm:$0xff]  }
 0x159   :  { %1425 = vmatprep.subr.bf16.mxu1 %v682_v7 }
 0x15c   :  { %1426 = vmatpush3.bf16.msra.mxu1 %v2048_v10  ;;  %v1628_v10 = vld [vmem:[%s2152_s3 + $0x30] ss:$8 sps:$4 sm:$0xff]  }
 0x15f   :  { %908 = vmatmul.mubr.bf16.vlgmr.msra.gmra.mrb[0].mxu1 %v1617_v9 }
 0x160   :  { %915 = vmatprep.mubr.bf16.mxu1 %v1620_v13 }
 0x167   :  { %916 = vmatmul.mubr.bf16.gmra.mrb[4].mxu1 %v1622_v41 }
 0x168   :  { %923 = vmatprep.mubr.bf16.mxu1 %v1623_v53 }
 0x16f   :  { %924 = vmatmul.mubr.bf16.gmra.mrb[8].mxu1 %v1625_v62 }
 0x170   :  { %931 = vmatprep.mubr.bf16.mxu1 %v1626_v8 }
 0x177   :  { %932 = vmatmul.mubr.bf16.gmra.mrb[12].mxu1 %v1628_v10 }
 0x178   :  { %939 = vmatprep.mubr.bf16.mxu1 %v1629_v11 }
 0x17f   :  { %940 = vmatmul.mubr.bf16.gmra.mrb[16].mxu1 %v1631_v14  ;;  %v758_v14 = vpop.permute.xlu0 %757 }
 0x180   :  { %947 = vmatprep.mubr.bf16.mxu1 %v1632_v16 }
 0x187   :  { %948 = vmatmul.mubr.bf16.gmra.mrb[20].mxu1 %v1634_v17 }
 0x188   :  { %955 = vmatprep.mubr.bf16.mxu1 %v1635_v18 }
 0x18f   :  { %956 = vmatmul.mubr.bf16.gmra.mrb[24].mxu1 %v1637_v19  ;;  %v763_v19 = vpop.permute.xlu1 %762 }
 0x190   :  { %963 = vmatprep.mubr.bf16.mxu1 %v1638_v20 }
 0x197   :  { %964 = vmatmul.mubr.bf16.gmra.mrb[28].mxu1 %v1640_v21 }
 0x198   :  { %1557 = vmatprep.mubr.bf16.mxu1 %v1641_v22 }
 0x232   :  { %v1427_v23 = vpop.f32.mrb[0].mxu1 }
 0x233   :  { %v1428_v24 = vpop.f32.mrb[1].mxu1 }
 0x234   :  { %v1429_v25 = vadd.f32 %v1428_v24, %v1427_v23  ;;  %v1430_v26 = vpop.f32.mrb[2].mxu1 }
 0x235   :  { %v1431_v28 = vpop.f32.mrb[3].mxu1 }
 0x236   :  { %v910_v31 = vadd.f32 %v1429_v25, %v718_v27  ;;  %v1432_v32 = vadd.f32 %v1431_v28, %v1430_v26  ;;  %v768_v28 = vpop.permute.xlu0 %767 }
 0x238   :  { %v913_v43 = vadd.f32 %v1432_v32, %v723_v33  ;;  %v972_v35 = vmax.f32 %v910_v31, 0.0 }
 0x23a   :  { %v973_v38 = vmax.f32 %v913_v43, 0.0  ;;  %v1433_v44 = vpop.f32.mrb[4].mxu1  ;;  %v773_v43 = vpop.permute.xlu1 %772 }
 0x23b   :  { %v1434_v40 = vpop.f32.mrb[5].mxu1 }
 0x23c   :  { %v1435_v36 = vadd.f32 %v1434_v40, %v1433_v44  ;;  %v1436_v37 = vpop.f32.mrb[6].mxu1  ;;  %v988_v39 = vpack.c.bf16 %v973_v38, %v972_v35 }
 0x23d   :  { %v1437_v45 = vpop.f32.mrb[7].mxu1 }
 0x23e   :  { %v918_v51 = vadd.f32 %v1435_v36, %v728_v42  ;;  %v1438_v46 = vadd.f32 %v1437_v45, %v1436_v37  ;;  %1541 = vmatprep.subr.bf16.mxu1 %v988_v39  ;;  %v778_v45 = vpop.permute.xlu0 %777 }
 0x23f   :  { %1542 = vmatpush3.bf16.msra.mxu1 %v988_v39 }
 0x240   :  { %v921_v49 = vadd.f32 %v1438_v46, %v733_v47  ;;  %v974_v52 = vmax.f32 %v918_v51, 0.0 }
 0x242   :  { %v975_v50 = vmax.f32 %v921_v49, 0.0  ;;  %v1439_v15 = vpop.f32.mrb[8].mxu1  ;;  %v783_v49 = vpop.permute.xlu1 %782 }
 0x243   :  { %v1440_v48 = vpop.f32.mrb[9].mxu1 }
 0x244   :  { %v1441_v54 = vadd.f32 %v1440_v48, %v1439_v15  ;;  %v1442_v61 = vpop.f32.mrb[10].mxu1  ;;  %v989_v63 = vpack.c.bf16 %v975_v50, %v974_v52 }
 0x245   :  { %v1443_v0 = vpop.f32.mrb[11].mxu1 }
 0x246   :  { %v926_v2 = vadd.f32 %v1441_v54, %v738_v12  ;;  %v1444_v59 = vadd.f32 %v1443_v0, %v1442_v61  ;;  %1543 = vmatprep.subr.bf16.mxu1 %v989_v63  ;;  %v788_v0 = vpop.permute.xlu0 %787 }
 0x247   :  { %1544 = vmatpush3.bf16.msra.mxu1 %v989_v63 }
 0x248   :  { %v929_v55 = vadd.f32 %v1444_v59, %v743_v57  ;;  %v976_v3 = vmax.f32 %v926_v2, 0.0 }
 0x24a   :  { %v977_v60 = vmax.f32 %v929_v55, 0.0  ;;  %v1445_v1 = vpop.f32.mrb[12].mxu1  ;;  %v793_v55 = vpop.permute.xlu1 %792 }
 0x24b   :  { %v1446_v30 = vpop.f32.mrb[13].mxu1 }
 0x24c   :  { %v1447_v56 = vadd.f32 %v1446_v30, %v1445_v1  ;;  %v1448_v4 = vpop.f32.mrb[14].mxu1  ;;  %v990_v5 = vpack.c.bf16 %v977_v60, %v976_v3 }
 0x24d   :  { %v1449_v29 = vpop.f32.mrb[15].mxu1 }
 0x24e   :  { %v934_v58 = vadd.f32 %v1447_v56, %v748_v6  ;;  %v1450_v7 = vadd.f32 %v1449_v29, %v1448_v4  ;;  %1545 = vmatprep.subr.bf16.mxu1 %v990_v5  ;;  %v1642_v56 = vld [vmem:[%s2153_s5 + $0x8] sm:$0xff]   ;;  %v1643_v4 = vld [vmem:[%s2153_s5 + $0x10] sm:$0xff]   ;;  %v1645_v6 = vld [vmem:[%s2154_s7] sm:$0xff]   ;;  %v1015_v29 = vpop.permute.xlu0 %1014 }
 0x24f   :  { %1546 = vmatpush3.bf16.msra.mxu1 %v990_v5  ;;  %v1644_v5 = vld [vmem:[%s2153_s5 + $0x18] sm:$0xff]  }
 0x250   :  { %v937_v9 = vadd.f32 %v1450_v7, %v753_v34  ;;  %v978_v13 = vmax.f32 %v934_v58, 0.0  ;;  %v1020_v58 = vpop.permute.xlu1 %1019 }
 0x252   :  { %v979_v41 = vmax.f32 %v937_v9, 0.0  ;;  %v1451_v53 = vpop.f32.mrb[16].mxu1  ;;  %v1025_v7 = vpop.permute.xlu0 %1024 }
 0x253   :  { %v1452_v62 = vpop.f32.mrb[17].mxu1 }
 0x254   :  { %v1453_v8 = vadd.f32 %v1452_v62, %v1451_v53  ;;  %v1454_v10 = vpop.f32.mrb[18].mxu1  ;;  %v991_v11 = vpack.c.bf16 %v979_v41, %v978_v13  ;;  %v1030_v34 = vpop.permute.xlu1 %1029 }
 0x255   :  { %v1455_v16 = vpop.f32.mrb[19].mxu1 }
 0x256   :  { %v942_v17 = vadd.f32 %v1453_v8, %v758_v14  ;;  %v1456_v18 = vadd.f32 %v1455_v16, %v1454_v10  ;;  %1547 = vmatprep.subr.bf16.mxu1 %v991_v11  ;;  %v1035_v53 = vpop.permute.xlu0 %1034 }
 0x257   :  { %1548 = vmatpush3.bf16.msra.mxu1 %v991_v11 }
 0x258   :  { %v945_v20 = vadd.f32 %v1456_v18, %v763_v19  ;;  %v980_v21 = vmax.f32 %v942_v17, 0.0  ;;  %v1040_v14 = vpop.permute.xlu1 %1039 }
 0x25a   :  { %v981_v22 = vmax.f32 %v945_v20, 0.0  ;;  %v1457_v23 = vpop.f32.mrb[20].mxu1 }
 0x25b   :  { %v1458_v24 = vpop.f32.mrb[21].mxu1 }
 0x25c   :  { %v1459_v25 = vadd.f32 %v1458_v24, %v1457_v23  ;;  %v1460_v26 = vpop.f32.mrb[22].mxu1  ;;  %v992_v27 = vpack.c.bf16 %v981_v22, %v980_v21  ;;  %v1045_v22 = vpop.permute.xlu0 %1044 }
 0x25d   :  { %v1461_v31 = vpop.f32.mrb[23].mxu1 }
 0x25e   :  { %v950_v32 = vadd.f32 %v1459_v25, %v768_v28  ;;  %v1462_v33 = vadd.f32 %v1461_v31, %v1460_v26  ;;  %1549 = vmatprep.subr.bf16.mxu1 %v992_v27 }
 0x25f   :  { %1550 = vmatpush3.bf16.msra.mxu1 %v992_v27  ;;  %v1050_v27 = vpop.permute.xlu1 %1049 }
 0x260   :  { %v953_v35 = vadd.f32 %v1462_v33, %v773_v43  ;;  %v982_v38 = vmax.f32 %v950_v32, 0.0 }
 0x262   :  { %v983_v44 = vmax.f32 %v953_v35, 0.0  ;;  %v1463_v40 = vpop.f32.mrb[24].mxu1 }
 0x263   :  { %v1464_v36 = vpop.f32.mrb[25].mxu1 }
 0x264   :  { %v1465_v37 = vadd.f32 %v1464_v36, %v1463_v40  ;;  %v1466_v39 = vpop.f32.mrb[26].mxu1  ;;  %v993_v42 = vpack.c.bf16 %v983_v44, %v982_v38 }
 0x265   :  { %v1467_v51 = vpop.f32.mrb[27].mxu1 }
 0x266   :  { %v958_v46 = vadd.f32 %v1465_v37, %v778_v45  ;;  %v1468_v47 = vadd.f32 %v1467_v51, %v1466_v39  ;;  %1551 = vmatprep.subr.bf16.mxu1 %v993_v42  ;;  %v1646_v39 = vld [vmem:[%s2154_s7 + $0x8] sm:$0xff]   ;;  %v1169_v45 = vpop.permute.xlu1 %1168 }
 0x267   :  { %1552 = vmatpush3.bf16.msra.mxu1 %v993_v42  ;;  %v1164_v42 = vpop.permute.xlu0 %1163 }
 0x268   :  { %v961_v52 = vadd.f32 %v1468_v47, %v783_v49  ;;  %v984_v50 = vmax.f32 %v958_v46, 0.0 }
 0x26a   :  { %v985_v15 = vmax.f32 %v961_v52, 0.0  ;;  %v1469_v48 = vpop.f32.mrb[28].mxu1  ;;  %v1179_v52 = vpop.permute.xlu1 %1178 }
 0x26b   :  { %v1470_v54 = vpop.f32.mrb[29].mxu1  ;;  %v1174_v51 = vpop.permute.xlu0 %1173 }
 0x26c   :  { %v1471_v61 = vadd.f32 %v1470_v54, %v1469_v48  ;;  %v1472_v63 = vpop.f32.mrb[30].mxu1  ;;  %v994_v12 = vpack.c.bf16 %v985_v15, %v984_v50 }
 0x26d   :  { %v1473_v2 = vpop.f32.mrb[31].mxu1 }
 0x26e   :  { %v966_v59 = vadd.f32 %v1471_v61, %v788_v0  ;;  %v1474_v57 = vadd.f32 %v1473_v2, %v1472_v63  ;;  %1553 = vmatprep.subr.bf16.mxu1 %v994_v12 }
 0x26f   :  { %1554 = vmatpush3.bf16.msra.mxu1 %v994_v12 }
 0x270   :  { %v969_v3 = vadd.f32 %v1474_v57, %v793_v55  ;;  %v986_v60 = vmax.f32 %v966_v59, 0.0  ;;  %v1590_v57 = vpop.permute.xlu0 %1589 }
 0x272   :  { %v987_v1 = vmax.f32 %v969_v3, 0.0  ;;  %v1592_v3 = vunpack.i.h.bf16 %v1590_v57 }
 0x274   :  { %v995_v30 = vpack.c.bf16 %v987_v1, %v986_v60  ;;  %v1591_v60 = vunpack.i.l.bf16 %v1590_v57 }
 0x276   :  { %1555 = vmatprep.subr.bf16.mxu1 %v995_v30 }
 0x277   :  { %1556 = vmatpush3.bf16.msra.mxu1 %v995_v30 }
 0x27a   :  { %1558 = vmatmul.mubr.bf16.vlgmr.msra.gmra.mrb[32].mxu1 %v1642_v56 }
 0x27b   :  { %1561 = vmatprep.mubr.bf16.mxu1 %v1643_v4 }
 0x282   :  { %1562 = vmatmul.mubr.bf16.gmra.mrb[36].mxu1 %v1644_v5 }
 0x283   :  { %1573 = vmatprep.mubr.msk.bf16.mxu1 %vm1191_vm1, %v1645_v6 }
 0x34d   :  { %v1559_v9 = vpop.f32.mrb[32].mxu1 }
 0x34e   :  { %v1119_v13 = vadd.f32 %v1559_v9, %v1025_v7  ;;  %v1110_v41 = vpop.f32.mrb[33].mxu1 }
 0x34f   :  { %v1111_v62 = vadd.f32 %v1110_v41, %v1015_v29  ;;  %v1560_v8 = vpop.f32.mrb[34].mxu1  ;;  %v1278_v29 = vpop.permute.xlu1 %1277  ;;  %v1304_v41 = vlaneseq }
 0x350   :  { %v1122_v10 = vadd.f32 %v1560_v8, %v1030_v34  ;;  %v1113_v11 = vpop.f32.mrb[35].mxu1  ;;  %v1143_v17 = vmax.f32 %v1119_v13, 0.0  ;;  %v1283_v34 = vpop.permute.xlu0 %1282 }
 0x351   :  { %v1114_v16 = vadd.f32 %v1113_v11, %v1020_v58  ;;  %v1141_v19 = vmax.f32 %v1111_v62, 0.0  ;;  %v1305_v8 = vshrl.u32 %v1304_v41, 7 }
 0x352   :  { %v1144_v18 = vmax.f32 %v1122_v10, 0.0 }
 0x353   :  { %v1142_v20 = vmax.f32 %v1114_v16, 0.0 }
 0x354   :  { %v1150_v21 = vpack.c.bf16 %v1144_v18, %v1143_v17  ;;  %v1302_v17 = vpop.permute.xlu1 %1301 }
 0x355   :  { %v1149_v23 = vpack.c.bf16 %v1142_v20, %v1141_v19  ;;  %v1563_v24 = vpop.f32.mrb[36].mxu1 }
 0x356   :  { %v1135_v25 = vadd.f32 %v1563_v24, %v1045_v22  ;;  %v1126_v26 = vpop.f32.mrb[37].mxu1 }
 0x357   :  { %v1127_v28 = vadd.f32 %v1126_v26, %v1035_v53  ;;  %v1564_v31 = vpop.f32.mrb[38].mxu1  ;;  %1565 = vmatprep.subr.bf16.mxu1 %v1149_v23 }
 0x358   :  { %v1138_v32 = vadd.f32 %v1564_v31, %v1050_v27  ;;  %v1129_v33 = vpop.f32.mrb[39].mxu1  ;;  %1566 = vmatpush3.bf16.msra.mxu1 %v1149_v23  ;;  %v1147_v35 = vmax.f32 %v1135_v25, 0.0 }
 0x359   :  { %v1130_v43 = vadd.f32 %v1129_v33, %v1040_v14  ;;  %1567 = vmatprep.subr.bf16.mxu1 %v1150_v21  ;;  %v1145_v44 = vmax.f32 %v1127_v28, 0.0  ;;  %v1306_v14 = vsub.s32 0, %v1305_v8 }
 0x35a   :  { %v1148_v38 = vmax.f32 %v1138_v32, 0.0 }
 0x35b   :  { %v1146_v40 = vmax.f32 %v1130_v43, 0.0  ;;  %v1307_v19 = vrot.slane %v1302_v17, %v1306_v14 }
 0x35c   :  { %v1152_v36 = vpack.c.bf16 %v1148_v38, %v1147_v35  ;;  %1568 = vmatpush3.bf16.msra.mxu1 %v1150_v21 }
 0x35d   :  { %v1151_v37 = vpack.c.bf16 %v1146_v40, %v1145_v44 }
 0x35f   :  { %1569 = vmatprep.subr.bf16.mxu1 %v1151_v37 }
 0x360   :  { %1570 = vmatpush3.bf16.msra.mxu1 %v1151_v37 }
 0x361   :  { %1571 = vmatprep.subr.bf16.mxu1 %v1152_v36 }
 0x364   :  { %1572 = vmatpush3.bf16.msra.mxu1 %v1152_v36 }
 0x367   :  { %1574 = vmatmul.mubr.msk.bf16.vlgmr.msra.gmra.mrb[40].mxu1 %vm1191_vm1, %v1646_v39 }
 0x43a   :  { %v1575_v46 = vpop.f32.mrb[40].mxu1 }
 0x43b   :  { %v1241_v47 = vadd.f32 %v1575_v46, %v1174_v51  ;;  %v1232_v49 = vpop.f32.mrb[41].mxu1 }
 0x43c   :  { %v1233_v50 = vadd.f32 %v1232_v49, %v1164_v42  ;;  %v1576_v15 = vpop.f32.mrb[42].mxu1 }
 0x43d   :  { %v1244_v48 = vadd.f32 %v1576_v15, %v1179_v52  ;;  %v1235_v54 = vpop.f32.mrb[43].mxu1  ;;  %v1249_v63 = vmax.f32 %v1241_v47, 0.0 }
 0x43e   :  { %v1236_v61 = vadd.f32 %v1235_v54, %v1169_v45  ;;  %v1247_v0 = vmax.f32 %v1233_v50, 0.0 }
 0x43f   :  { %v1250_v12 = vmax.f32 %v1244_v48, 0.0 }
 0x440   :  { %v1248_v2 = vmax.f32 %v1236_v61, 0.0 }
 0x441   :  { %v1252_v59 = vpack.c.bf16 %v1250_v12, %v1249_v63 }
 0x442   :  { %v1251_v55 = vpack.c.bf16 %v1248_v2, %v1247_v0 }
 0x443   :  { %v1263_v1 = vunpack.c.l.bf16 %v1252_v59  ;;  %v1264_v4 = vunpack.c.h.bf16 %v1252_v59 }
 0x444   :  { %v1261_v30 = vunpack.c.l.bf16 %v1251_v55  ;;  %v1262_v56 = vunpack.c.h.bf16 %v1251_v55 }
 0x445   :  { %v1287_v58 = vmul.f32 %v1278_v29, %v1263_v1  ;;  %v1288_v9 = vmul.f32 %v1283_v34, %v1264_v4 }
 0x446   :  { %v1285_v5 = vmul.f32 %v1591_v60, %v1261_v30  ;;  %v1286_v6 = vmul.f32 %v1592_v3, %v1262_v56 }
 0x448   :  { %v1289_v7 = vadd.f32 %v1286_v6, %v1285_v5 }
 0x44a   :  { %v1290_v13 = vadd.f32 %v1289_v7, %v1287_v58 }
 0x44c   :  { %v1291_v53 = vadd.f32 %v1290_v13, %v1288_v9 }
 0x44e   :  { %v1292_v62 = vrot.slane %v1291_v53, 4 }
 0x450   :  { %v1293_v10 = vadd.f32 %v1292_v62, %v1291_v53 }
 0x452   :  { %v1294_v11 = vrot.slane %v1293_v10, 2 }
 0x454   :  { %v1295_v16 = vadd.f32 %v1294_v11, %v1293_v10 }
 0x456   :  { %v1296_v18 = vrot.slane %v1295_v16, 1 }
 0x458   :  { %v1297_v20 = vadd.f32 %v1296_v18, %v1295_v16 }
 0x45a   :  { %v1308_v21 = vadd.f32 %v1307_v19, %v1297_v20 }
 0x45c   :  { %1309 = vst [vmem:[%s2155_s11] sm:$0x1] %v1308_v21 }

</bundles_post_ra>
